<compile_context>
chip_gen: v5e
topology: v5e:2x2
jax: 0.10.0
libtpu: 0.0.40
codegen_flags: <defaults>
</compile_context>

<pallas_src>
import functools

import jax
import jax.numpy as jnp
from jax.experimental import pallas as pl
from jax.experimental.pallas import tpu as pltpu


def _round_up(x, m):
    return (x + m - 1) // m * m


# ------------------------------- kernel ---------------------------------------
def ppo_critic_kernel(feature_ref, moves_ref, w1p_ref, w2p_ref, wfp_ref, wmp_ref,
                      out_ref, *, F, K, D,
                      o_b1, o_b2, o_wfm, o_bf, o_bm1, o_wm2, o_bm2):
    KD, K64 = K * D, K * 64

    # Stage 1: all K embedder first layers (Linear(D,64)+ReLU) as ONE
    # block-diagonal matmul.
    x = moves_ref[...]                                                  # (TB, K*D)
    h1 = jnp.maximum(
        jnp.dot(x, w1p_ref[0:KD, :], preferred_element_type=jnp.float32)
        + w1p_ref[o_b1:o_b1 + 1, :], 0.0)                               # (TB, K*64)

    # Stage 2: all K embedder second layers (Linear(64,1)+ReLU) as ONE
    # block-diagonal matmul (avoids K separate N=1 MXU pushes).
    m = jnp.maximum(
        jnp.dot(h1, w2p_ref[0:K64, :], preferred_element_type=jnp.float32)
        + w2p_ref[o_b2:o_b2 + 1, :], 0.0)                               # (TB, K)

    # embedder_final: cat(feature, moves) @ Wf + bf ; Tanh.
    acc = (jnp.dot(feature_ref[...], wfp_ref[0:F, :],
                   preferred_element_type=jnp.float32)
           + jnp.dot(m, wfp_ref[o_wfm:o_wfm + K, :],
                     preferred_element_type=jnp.float32)
           + wfp_ref[o_bf:o_bf + 1, :])
    h = jnp.tanh(acc)                                                   # (TB, 64)

    # model[0:2]: Linear(64,16) + Tanh.
    h2 = jnp.tanh(
        jnp.dot(h, wmp_ref[0:64, :], preferred_element_type=jnp.float32)
        + wmp_ref[o_bm1:o_bm1 + 1, :])                                  # (TB, 16)

    # model[2]: Linear(16,1) -> VPU multiply + lane reduce (no N=1 MXU push).
    wm2_row = wmp_ref[o_wm2:o_wm2 + 1, :]                               # (1, 16) = wm2^T
    bm2 = wmp_ref[o_bm2:o_bm2 + 1, 0:1]                                 # (1, 1)
    out_ref[...] = jnp.sum(h2 * wm2_row, axis=-1, keepdims=True) + bm2  # (TB, 1)


# --------------------------- wrapper-side packing ------------------------------
def _pack_rows(blocks, width):
    """Row-stack 2-D blocks into one (rows, width) f32 buffer; every block starts
    at a row offset that is a multiple of 8 (sublane aligned). Returns buffer and
    per-block row offsets. Narrower blocks are zero-padded on the lane axis."""
    offs, rows = [], 0
    for b in blocks:
        offs.append(rows)
        rows += _round_up(b.shape[0], 8)
    buf = jnp.zeros((rows, width), jnp.float32)
    for off, b in zip(offs, blocks):
        buf = buf.at[off:off + b.shape[0], :b.shape[1]].set(b.astype(jnp.float32))
    return buf, offs


def pack_params(params, dim, feature_dim):
    K = params["w1"].shape[0]
    D, F = dim, feature_dim

    # Block-diagonal packing of the K embedder weights (built once, wrapper-side).
    w1_blk = jax.scipy.linalg.block_diag(*[params["w1"][k] for k in range(K)])  # (K*D, K*64)
    w2_blk = jax.scipy.linalg.block_diag(*[params["w2"][k] for k in range(K)])  # (K*64, K)
    b1_row = params["b1"].reshape(1, K * 64)
    b2_row = params["b2"].reshape(1, K)

    w1p, (_, o_b1) = _pack_rows([w1_blk, b1_row], K * 64)
    w2p, (_, o_b2) = _pack_rows([w2_blk, b2_row], K)
    wfp, (_, o_wfm, o_bf) = _pack_rows(
        [params["wf_feat"], params["wf_moves"], params["bf"]], 64)
    wmp, (_, o_bm1, o_wm2, o_bm2) = _pack_rows(
        [params["wm1"], params["bm1"], params["wm2"].T, params["bm2"]], 16)

    static = dict(F=F, K=K, D=D, o_b1=o_b1, o_b2=o_b2, o_wfm=o_wfm, o_bf=o_bf,
                  o_bm1=o_bm1, o_wm2=o_wm2, o_bm2=o_bm2)
    return (w1p, w2p, wfp, wmp), static


# -------------------------------- forward --------------------------------------
def ppo_critic_forward(feature, moves, params, *, batch_tile=512):
    B, F = feature.shape
    K, _, D = moves.shape

    # (K, B, D) -> one lane-contiguous (B, K*D) activation slab.
    moves_flat = jnp.transpose(moves, (1, 0, 2)).reshape(B, K * D)

    (w1p, w2p, wfp, wmp), st = pack_params(params, D, F)

    # Batch grid: tile TB (>= 8, <= batch_tile); pad batch to a multiple of TB.
    TB = min(batch_tile, _round_up(B, 8))
    B_pad = _round_up(B, TB)
    if B_pad != B:
        feature = jnp.pad(feature, ((0, B_pad - B), (0, 0)))
        moves_flat = jnp.pad(moves_flat, ((0, B_pad - B), (0, 0)))

    kernel = functools.partial(ppo_critic_kernel, **st)
    out = pl.pallas_call(
        kernel,
        out_shape=jax.ShapeDtypeStruct((B_pad, 1), jnp.float32),
        grid=(B_pad // TB,),
        in_specs=[
            pl.BlockSpec((TB, F), lambda i: (i, 0)),            # feature tile
            pl.BlockSpec((TB, K * D), lambda i: (i, 0)),        # moves tile
            pl.BlockSpec(w1p.shape, lambda i: (0, 0)),          # weights stay resident
            pl.BlockSpec(w2p.shape, lambda i: (0, 0)),
            pl.BlockSpec(wfp.shape, lambda i: (0, 0)),
            pl.BlockSpec(wmp.shape, lambda i: (0, 0)),
        ],
        out_specs=pl.BlockSpec((TB, 1), lambda i: (i, 0)),
        compiler_params=pltpu.CompilerParams(
            dimension_semantics=("parallel",)),
    )(feature, moves_flat, w1p, w2p, wfp, wmp)
    return out[:B]


# ----------------------------- pure-JAX reference -------------------------------
def ppo_critic_ref(feature, moves, p):
    K = moves.shape[0]
    outs = []
    for k in range(K):
        h1 = jax.nn.relu(moves[k] @ p["w1"][k] + p["b1"][k])
        outs.append(jax.nn.relu(h1 @ p["w2"][k] + p["b2"][k]))
    m = jnp.concatenate(outs, axis=-1)                                 # (B, K)
    x = jnp.concatenate([feature, m], axis=-1)                         # (B, F+K)
    wf = jnp.concatenate([p["wf_feat"], p["wf_moves"]], axis=0)        # (F+K, 64)
    h = jnp.tanh(x @ wf + p["bf"])
    h2 = jnp.tanh(h @ p["wm1"] + p["bm1"])
    return h2 @ p["wm2"] + p["bm2"]


# ----------------------------- parameter init -----------------------------------
def _linear_init(key, fan_in, fan_out):
    # PyTorch default Linear init: U(-1/sqrt(fan_in), 1/sqrt(fan_in))
    kw, kb = jax.random.split(key)
    bound = 1.0 / jnp.sqrt(jnp.float32(fan_in))
    w = jax.random.uniform(kw, (fan_in, fan_out), jnp.float32, -bound, bound)
    b = jax.random.uniform(kb, (fan_out,), jnp.float32, -bound, bound)
    return w, b


def make_params(key, dim, optimizer_num, feature_dim):
    K = 2 * optimizer_num
    keys = jax.random.split(key, 2 * K + 3)
    w1, b1, w2, b2 = [], [], [], []
    for k in range(K):
        wa, ba = _linear_init(keys[2 * k], dim, 64)
        wb, bb = _linear_init(keys[2 * k + 1], 64, 1)
        w1.append(wa); b1.append(ba); w2.append(wb); b2.append(bb)
    wf, bf = _linear_init(keys[2 * K], feature_dim + K, 64)
    wm1, bm1 = _linear_init(keys[2 * K + 1], 64, 16)
    wm2, bm2 = _linear_init(keys[2 * K + 2], 16, 1)
    return {
        "w1": jnp.stack(w1),                  # (K, dim, 64)
        "b1": jnp.stack(b1),                  # (K, 64)
        "w2": jnp.stack(w2),                  # (K, 64, 1)
        "b2": jnp.stack(b2),                  # (K, 1)
        "wf_feat": wf[:feature_dim],          # (F, 64)
        "wf_moves": wf[feature_dim:],         # (K, 64)
        "bf": bf[None, :],                    # (1, 64)
        "wm1": wm1,                           # (64, 16)
        "bm1": bm1[None, :],                  # (1, 16)
        "wm2": wm2,                           # (16, 1)
        "bm2": bm2[None, :],                  # (1, 1)
    }


if __name__ == "__main__":
    dim, optimizer_num, feature_dim, batch = 8, 3, 9, 2
    K = 2 * optimizer_num

    key = jax.random.PRNGKey(0)
    k_param, k_feat, k_moves = jax.random.split(key, 3)

    params = make_params(k_param, dim, optimizer_num, feature_dim)
    feature = jax.random.normal(k_feat, (batch, feature_dim), jnp.float32)   # obs[:, 0]
    moves = jax.random.normal(k_moves, (K, batch, dim), jnp.float32)         # obs[:, 1:] stacked

    out = ppo_critic_forward(feature, moves, params)
    jax.block_until_ready(out)

    ref = ppo_critic_ref(feature, moves, params)
    assert out.shape == (batch, 1), out.shape
    assert jnp.allclose(out, ref, atol=1e-5, rtol=1e-5), (out, ref)

    print("KERNEL_OK")
</pallas_src>

<mosaic_0001>
module attributes {stable_mosaic.version = 11 : i64} {
  func.func @ppo_critic_kernel(%arg0: i32, %arg1: memref<8x9xf32, #tpu.memory_space<vmem>>, %arg2: memref<8x48xf32, #tpu.memory_space<vmem>>, %arg3: memref<56x384xf32, #tpu.memory_space<vmem>>, %arg4: memref<392x6xf32, #tpu.memory_space<vmem>>, %arg5: memref<32x64xf32, #tpu.memory_space<vmem>>, %arg6: memref<88x16xf32, #tpu.memory_space<vmem>>, %arg7: memref<8x1xf32, #tpu.memory_space<vmem>>) attributes {dimension_semantics = [#tpu.dimension_semantics<parallel>], iteration_bounds = array<i64: 1>, scalar_prefetch = 0 : i64, scratch_operands = 0 : i64, tpu.core_type = #tpu.core_type<tc>, window_params = [{transform_indices = @transform_0, window_bounds = array<i64: 8, 9>}, {transform_indices = @transform_1, window_bounds = array<i64: 8, 48>}, {pipeline_mode = #tpu.pipeline_mode<synchronous>, transform_indices = @transform_2, window_bounds = array<i64: 56, 384>}, {pipeline_mode = #tpu.pipeline_mode<synchronous>, transform_indices = @transform_3, window_bounds = array<i64: 392, 6>}, {pipeline_mode = #tpu.pipeline_mode<synchronous>, transform_indices = @transform_4, window_bounds = array<i64: 32, 64>}, {pipeline_mode = #tpu.pipeline_mode<synchronous>, transform_indices = @transform_5, window_bounds = array<i64: 88, 16>}, {transform_indices = @transform_6, window_bounds = array<i64: 8, 1>}]} {
    %c0 = arith.constant 0 : index
    %c0_0 = arith.constant 0 : index
    %0 = vector.load %arg2[%c0, %c0_0] : memref<8x48xf32, #tpu.memory_space<vmem>>, vector<8x48xf32>
    %c0_1 = arith.constant 0 : index
    %c0_2 = arith.constant 0 : index
    %1 = vector.load %arg3[%c0_1, %c0_2] : memref<56x384xf32, #tpu.memory_space<vmem>>, vector<48x384xf32>
    %cst = arith.constant dense<0.000000e+00> : vector<8x384xf32>
    %2 = tpu.matmul %0, %1, %cst {dimension_numbers = #tpu.dot_dimension_numbers<[1], [0], [0], [1], [0, 0, 1, 1], [], []>} : vector<8x48xf32>, vector<48x384xf32>, vector<8x384xf32> -> vector<8x384xf32>
    %c48 = arith.constant 48 : index
    %c0_3 = arith.constant 0 : index
    %3 = vector.load %arg3[%c48, %c0_3] : memref<56x384xf32, #tpu.memory_space<vmem>>, vector<1x384xf32>
    %4 = vector.broadcast %3 : vector<1x384xf32> to vector<8x384xf32>
    %5 = arith.addf %2, %4 : vector<8x384xf32>
    %cst_4 = arith.constant 0.000000e+00 : f32
    %6 = vector.broadcast %cst_4 : f32 to vector<8x384xf32>
    %7 = arith.maximumf %5, %6 : vector<8x384xf32>
    %c0_5 = arith.constant 0 : index
    %c0_6 = arith.constant 0 : index
    %8 = vector.load %arg4[%c0_5, %c0_6] : memref<392x6xf32, #tpu.memory_space<vmem>>, vector<384x6xf32>
    %cst_7 = arith.constant dense<0.000000e+00> : vector<8x6xf32>
    %9 = tpu.matmul %7, %8, %cst_7 {dimension_numbers = #tpu.dot_dimension_numbers<[1], [0], [0], [1], [0, 0, 1, 1], [], []>} : vector<8x384xf32>, vector<384x6xf32>, vector<8x6xf32> -> vector<8x6xf32>
    %c384 = arith.constant 384 : index
    %c0_8 = arith.constant 0 : index
    %10 = vector.load %arg4[%c384, %c0_8] : memref<392x6xf32, #tpu.memory_space<vmem>>, vector<1x6xf32>
    %11 = vector.broadcast %10 : vector<1x6xf32> to vector<8x6xf32>
    %12 = arith.addf %9, %11 : vector<8x6xf32>
    %cst_9 = arith.constant 0.000000e+00 : f32
    %13 = vector.broadcast %cst_9 : f32 to vector<8x6xf32>
    %14 = arith.maximumf %12, %13 : vector<8x6xf32>
    %c0_10 = arith.constant 0 : index
    %c0_11 = arith.constant 0 : index
    %15 = vector.load %arg1[%c0_10, %c0_11] : memref<8x9xf32, #tpu.memory_space<vmem>>, vector<8x9xf32>
    %c0_12 = arith.constant 0 : index
    %c0_13 = arith.constant 0 : index
    %16 = vector.load %arg5[%c0_12, %c0_13] : memref<32x64xf32, #tpu.memory_space<vmem>>, vector<9x64xf32>
    %cst_14 = arith.constant dense<0.000000e+00> : vector<8x64xf32>
    %17 = tpu.matmul %15, %16, %cst_14 {dimension_numbers = #tpu.dot_dimension_numbers<[1], [0], [0], [1], [0, 0, 1, 1], [], []>} : vector<8x9xf32>, vector<9x64xf32>, vector<8x64xf32> -> vector<8x64xf32>
    %c16 = arith.constant 16 : index
    %c0_15 = arith.constant 0 : index
    %18 = vector.load %arg5[%c16, %c0_15] : memref<32x64xf32, #tpu.memory_space<vmem>>, vector<6x64xf32>
    %cst_16 = arith.constant dense<0.000000e+00> : vector<8x64xf32>
    %19 = tpu.matmul %14, %18, %cst_16 {dimension_numbers = #tpu.dot_dimension_numbers<[1], [0], [0], [1], [0, 0, 1, 1], [], []>} : vector<8x6xf32>, vector<6x64xf32>, vector<8x64xf32> -> vector<8x64xf32>
    %20 = arith.addf %17, %19 : vector<8x64xf32>
    %c24 = arith.constant 24 : index
    %c0_17 = arith.constant 0 : index
    %21 = vector.load %arg5[%c24, %c0_17] : memref<32x64xf32, #tpu.memory_space<vmem>>, vector<1x64xf32>
    %22 = vector.broadcast %21 : vector<1x64xf32> to vector<8x64xf32>
    %23 = arith.addf %20, %22 : vector<8x64xf32>
    %24 = math.tanh %23 : vector<8x64xf32>
    %c0_18 = arith.constant 0 : index
    %c0_19 = arith.constant 0 : index
    %25 = vector.load %arg6[%c0_18, %c0_19] : memref<88x16xf32, #tpu.memory_space<vmem>>, vector<64x16xf32>
    %cst_20 = arith.constant dense<0.000000e+00> : vector<8x16xf32>
    %26 = tpu.matmul %24, %25, %cst_20 {dimension_numbers = #tpu.dot_dimension_numbers<[1], [0], [0], [1], [0, 0, 1, 1], [], []>} : vector<8x64xf32>, vector<64x16xf32>, vector<8x16xf32> -> vector<8x16xf32>
    %c64 = arith.constant 64 : index
    %c0_21 = arith.constant 0 : index
    %27 = vector.load %arg6[%c64, %c0_21] : memref<88x16xf32, #tpu.memory_space<vmem>>, vector<1x16xf32>
    %28 = vector.broadcast %27 : vector<1x16xf32> to vector<8x16xf32>
    %29 = arith.addf %26, %28 : vector<8x16xf32>
    %30 = math.tanh %29 : vector<8x16xf32>
    %c72 = arith.constant 72 : index
    %c0_22 = arith.constant 0 : index
    %31 = vector.load %arg6[%c72, %c0_22] : memref<88x16xf32, #tpu.memory_space<vmem>>, vector<1x16xf32>
    %c80 = arith.constant 80 : index
    %c0_23 = arith.constant 0 : index
    %32 = vector.load %arg6[%c80, %c0_23] : memref<88x16xf32, #tpu.memory_space<vmem>>, vector<1x1xf32>
    %33 = vector.broadcast %31 : vector<1x16xf32> to vector<8x16xf32>
    %34 = arith.mulf %30, %33 : vector<8x16xf32>
    %cst_24 = arith.constant dense<0.000000e+00> : vector<8xf32>
    %35 = vector.multi_reduction <add>, %34, %cst_24 [1] : vector<8x16xf32> to vector<8xf32>
    %36 = vector.shape_cast %35 : vector<8xf32> to vector<8x1xf32>
    %37 = vector.broadcast %32 : vector<1x1xf32> to vector<8x1xf32>
    %38 = arith.addf %36, %37 : vector<8x1xf32>
    %c0_25 = arith.constant 0 : index
    %c0_26 = arith.constant 0 : index
    %39 = vector.load %arg7[%c0_25, %c0_26] : memref<8x1xf32, #tpu.memory_space<vmem>>, vector<8x1xf32>
    tpu.vector_store %arg7[%c0_25, %c0_26], %38 {strides = array<i32>} : memref<8x1xf32, #tpu.memory_space<vmem>>, vector<8x1xf32>,
    return
  }
  func.func @transform_0(%arg0: i32) -> (i32, i32) {
    %c0_i32 = arith.constant 0 : i32
    %c0_i32_0 = arith.constant 0 : i32
    return %arg0, %c0_i32 : i32, i32
  }
  func.func @transform_1(%arg0: i32) -> (i32, i32) {
    %c0_i32 = arith.constant 0 : i32
    %c0_i32_0 = arith.constant 0 : i32
    return %arg0, %c0_i32 : i32, i32
  }
  func.func @transform_2(%arg0: i32) -> (i32, i32) {
    %c0_i32 = arith.constant 0 : i32
    %c0_i32_0 = arith.constant 0 : i32
    %c0_i32_1 = arith.constant 0 : i32
    return %c0_i32, %c0_i32_0 : i32, i32
  }
  func.func @transform_3(%arg0: i32) -> (i32, i32) {
    %c0_i32 = arith.constant 0 : i32
    %c0_i32_0 = arith.constant 0 : i32
    %c0_i32_1 = arith.constant 0 : i32
    return %c0_i32, %c0_i32_0 : i32, i32
  }
  func.func @transform_4(%arg0: i32) -> (i32, i32) {
    %c0_i32 = arith.constant 0 : i32
    %c0_i32_0 = arith.constant 0 : i32
    %c0_i32_1 = arith.constant 0 : i32
    return %c0_i32, %c0_i32_0 : i32, i32
  }
  func.func @transform_5(%arg0: i32) -> (i32, i32) {
    %c0_i32 = arith.constant 0 : i32
    %c0_i32_0 = arith.constant 0 : i32
    %c0_i32_1 = arith.constant 0 : i32
    return %c0_i32, %c0_i32_0 : i32, i32
  }
  func.func @transform_6(%arg0: i32) -> (i32, i32) {
    %c0_i32 = arith.constant 0 : i32
    %c0_i32_0 = arith.constant 0 : i32
    return %arg0, %c0_i32 : i32, i32
  }
}

</mosaic_0001>

<bundles_post_ra>
// kernel: tpu_custom_call.1
= control target key start
LH: loop header
LB: loop body
LE: loop exit
PB: predicated region body
PF: predicated region fallthrough
CT: control target
= control target key end

     0   :  { %vm51_vm0 = vcmask 392192   ;;  %vm237_vm1 = vcmask 1045504   ;;  %vm265_vm2 = vcmask 1040384   ;;  %vm233_vm3 = vcmask 48128   ;;  %s658_s2 = inlined_call_operand.vmem [shape: f32[56,384], index: 2, kind: input, shape index: {}]   ;;  %s659_s3 = inlined_call_operand.vmem [shape: f32[392,6], index: 3, kind: input, shape index: {}]   ;;  %s660_s1 = inlined_call_operand.vmem [shape: f32[8,48], index: 1, kind: input, shape index: {}]   ;;  %s661_s4 = inlined_call_operand.vmem [shape: f32[32,64], index: 4, kind: input, shape index: {}]   ;;  %s662_s0 = inlined_call_operand.vmem [shape: f32[8,9], index: 0, kind: input, shape index: {}]   ;;  %s663_s5 = inlined_call_operand.vmem [shape: f32[88,16], index: 5, kind: input, shape index: {}]   ;;  %s664_s6 = inlined_call_operand.vmem [shape: f32[8,1], index: 6, kind: output, shape index: {}]  }
   0x1   :  { %v39_v0 = vld [vmem:[%s658_s2 + $0x78] sm:$0xff]  ;;  %v36_v1 = vld [vmem:[%s658_s2 + $0x60] sm:$0xff]  ;;  %v41_v2 = vld [vmem:[%s658_s2 + $0x88] sm:$0xff]  ;;  %vm261_vm4 = vcmask 72704   ;;  %vm303_vm5 = vcmask 523264   ;;  %vm332_vm6 = vcmask 130048  }
   0x2   :  { %65 = vmatpush.msra.mxu0 %v39_v0  ;;  %v38_v3 = vld [vmem:[%s658_s2 + $0x70] sm:$0xff]  ;;  %v33_v4 = vld [vmem:[%s658_s2 + $0x48] sm:$0xff]  ;;  %105 = vmatpush.msra.mxu2 %v41_v2  ;;  %v40_v5 = vld [vmem:[%s658_s2 + $0x80] sm:$0xff]  ;;  %vm338_vm7 = vcmask 7168  }
   0x3   :  { %85 = vmatpush.msra.mxu1 %v40_v5  ;;  %v35_v6 = vld [vmem:[%s658_s2 + $0x58] sm:$0xff]  ;;  %v37_v7 = vld [vmem:[%s658_s2 + $0x68] sm:$0xff]  ;;  %v30_v8 = vld [vmem:[%s658_s2 + $0x30] sm:$0xff] }
   0x4   :  { %66 = vmatpush.msra.mxu0 %v36_v1  ;;  %106 = vmatpush.msra.mxu2 %v38_v3  ;;  %v34_v9 = vld [vmem:[%s658_s2 + $0x50] sm:$0xff]  ;;  %v32_v10 = vld [vmem:[%s658_s2 + $0x40] sm:$0xff]  ;;  %v27_v11 = vld [vmem:[%s658_s2 + $0x18] sm:$0xff] }
   0x5   :  { %86 = vmatpush.msra.mxu1 %v37_v7  ;;  %v31_v12 = vld [vmem:[%s658_s2 + $0x38] sm:$0xff]  ;;  %v29_v14 = vld [vmem:[%s658_s2 + $0x28] sm:$0xff]  ;;  %v132_v15 = vld [vmem:[%s659_s3 + $0x70] sm:$0xff] }
   0x6   :  { %67 = vmatpush.msra.mxu0 %v33_v4  ;;  %107 = vmatpush.msra.mxu2 %v35_v6  ;;  %v133_v13 = vld [vmem:[%s659_s3 + $0x78] sm:$0xff]  ;;  %v24_v16 = vld [vmem:[%s658_s2] sm:$0xff]  ;;  %v26_v19 = vld [vmem:[%s658_s2 + $0x10] sm:$0xff] }
   0x7   :  { %87 = vmatpush.msra.mxu1 %v34_v9  ;;  %v28_v17 = vld [vmem:[%s658_s2 + $0x20] sm:$0xff]  ;;  %168 = vmatpush.msra.mxu3 %v133_v13  ;;  %v25_v20 = vld [vmem:[%s658_s2 + $0x8] sm:$0xff]  ;;  %v149_v22 = vld [vmem:[%s659_s3 + $0xf8] sm:$0xff] }
   0x8   :  { %68 = vmatpush.msra.mxu0 %v30_v8  ;;  %108 = vmatpush.msra.mxu2 %v32_v10  ;;  %v23_v18 = vld [vmem:[%s660_s1] sm:$0xff]  ;;  %v131_v21 = vld [vmem:[%s659_s3 + $0x68] sm:$0xff]  ;;  %v165_v23 = vld [vmem:[%s659_s3 + $0x178] sm:$0xff] }
   0x9   :  { %88 = vmatpush.msra.mxu1 %v31_v12  ;;  %169 = vmatpush.msra.mxu3 %v132_v15  ;;  %v130_v24 = vld [vmem:[%s659_s3 + $0x60] sm:$0xff]  ;;  %v148_v25 = vld [vmem:[%s659_s3 + $0xf0] sm:$0xff]  ;;  %v129_v27 = vld [vmem:[%s659_s3 + $0x58] sm:$0xff] }
   0xa   :  { %69 = vmatpush.msra.mxu0 %v27_v11  ;;  %109 = vmatpush.msra.mxu2 %v29_v14  ;;  %v164_v26 = vld [vmem:[%s659_s3 + $0x170] sm:$0xff]  ;;  %v147_v28 = vld [vmem:[%s659_s3 + $0xe8] sm:$0xff]  ;;  %v146_v31 = vld [vmem:[%s659_s3 + $0xe0] sm:$0xff] }
   0xb   :  { %89 = vmatpush.msra.mxu1 %v28_v17  ;;  %170 = vmatpush.msra.mxu3 %v131_v21  ;;  %v163_v29 = vld [vmem:[%s659_s3 + $0x168] sm:$0xff]  ;;  %v128_v30 = vld [vmem:[%s659_s3 + $0x50] sm:$0xff]  ;;  %v162_v32 = vld [vmem:[%s659_s3 + $0x160] sm:$0xff] }
   0xc   :  { %70 = vmatpush.msra.mxu0 %v24_v16  ;;  %110 = vmatpush.msra.mxu2 %v26_v19  ;;  %v127_v33 = vld [vmem:[%s659_s3 + $0x48] sm:$0xff]  ;;  %v145_v34 = vld [vmem:[%s659_s3 + $0xd8] sm:$0xff]  ;;  %v126_v36 = vld [vmem:[%s659_s3 + $0x40] sm:$0xff] }
   0xd   :  { %345 = vmatmul.msk.f32.vlgmr.msra.gmra.mxu0 %vm51_vm0, %v23_v18  ;;  %347 = vmatmul.msk.f32.vlgmr.msra.gmra.mxu2 %vm51_vm0, %v23_v18  ;;  %v161_v35 = vld [vmem:[%s659_s3 + $0x158] sm:$0xff]  ;;  %v144_v37 = vld [vmem:[%s659_s3 + $0xd0] sm:$0xff]  ;;  %v143_v40 = vld [vmem:[%s659_s3 + $0xc8] sm:$0xff] }
   0xe   :  { %90 = vmatpush.msra.mxu1 %v25_v20  ;;  %188 = vmatpush.msrb.mxu0 %v149_v22  ;;  %v160_v38 = vld [vmem:[%s659_s3 + $0x150] sm:$0xff]  ;;  %v125_v39 = vld [vmem:[%s659_s3 + $0x38] sm:$0xff]  ;;  %v159_v41 = vld [vmem:[%s659_s3 + $0x148] sm:$0xff] }
   0xf   :  { %346 = vmatmul.msk.f32.vlgmr.msra.gmra.mxu1 %vm51_vm0, %v23_v18  ;;  %171 = vmatpush.msra.mxu3 %v130_v24  ;;  %v124_v42 = vld [vmem:[%s659_s3 + $0x30] sm:$0xff]  ;;  %v142_v43 = vld [vmem:[%s659_s3 + $0xc0] sm:$0xff]  ;;  %v123_v45 = vld [vmem:[%s659_s3 + $0x28] sm:$0xff] }
  0x10   :  { %208 = vmatpush.msrb.mxu1 %v165_v23  ;;  %189 = vmatpush.msrb.mxu0 %v148_v25  ;;  %v158_v44 = vld [vmem:[%s659_s3 + $0x140] sm:$0xff]  ;;  %v141_v46 = vld [vmem:[%s659_s3 + $0xb8] sm:$0xff]  ;;  %v120_v49 = vld [vmem:[%s659_s3 + $0x10] sm:$0xff] }
  0x11   :  { %172 = vmatpush.msra.mxu3 %v129_v27  ;;  %v122_v47 = vld [vmem:[%s659_s3 + $0x20] sm:$0xff]  ;;  %v121_v48 = vld [vmem:[%s659_s3 + $0x18] sm:$0xff]  ;;  %v140_v50 = vld [vmem:[%s659_s3 + $0xb0] sm:$0xff] }
  0x12   :  { %209 = vmatpush.msrb.mxu1 %v164_v26  ;;  %190 = vmatpush.msrb.mxu0 %v147_v28  ;;  %v157_v51 = vld [vmem:[%s659_s3 + $0x138] sm:$0xff]  ;;  %v119_v52 = vld [vmem:[%s659_s3 + $0x8] sm:$0xff]  ;;  %v156_v54 = vld [vmem:[%s659_s3 + $0x130] sm:$0xff] }
  0x13   :  { %173 = vmatpush.msra.mxu3 %v128_v30  ;;  %v139_v53 = vld [vmem:[%s659_s3 + $0xa8] sm:$0xff]  ;;  %v118_v55 = vld [vmem:[%s659_s3] sm:$0xff]  ;;  %v137_v58 = vld [vmem:[%s659_s3 + $0x98] sm:$0xff] }
  0x14   :  { %210 = vmatpush.msrb.mxu1 %v163_v29  ;;  %191 = vmatpush.msrb.mxu0 %v146_v31  ;;  %v138_v56 = vld [vmem:[%s659_s3 + $0xa0] sm:$0xff]  ;;  %v155_v57 = vld [vmem:[%s659_s3 + $0x128] sm:$0xff]  ;;  %v136_v60 = vld [vmem:[%s659_s3 + $0x90] sm:$0xff] }
  0x15   :  { %174 = vmatpush.msra.mxu3 %v127_v33  ;;  %v154_v59 = vld [vmem:[%s659_s3 + $0x120] sm:$0xff]  ;;  %v153_v61 = vld [vmem:[%s659_s3 + $0x118] sm:$0xff]  ;;  %v135_v62 = vld [vmem:[%s659_s3 + $0x88] sm:$0xff] }
  0x16   :  { %211 = vmatpush.msrb.mxu1 %v162_v32  ;;  %192 = vmatpush.msrb.mxu0 %v145_v34  ;;  %v152_v63 = vld [vmem:[%s659_s3 + $0x110] sm:$0xff]  ;;  %v134_v0 = vld [vmem:[%s659_s3 + $0x80] sm:$0xff]  ;;  %v151_v1 = vld [vmem:[%s659_s3 + $0x108] sm:$0xff] }
  0x17   :  { %175 = vmatpush.msra.mxu3 %v126_v36  ;;  %v150_v2 = vld [vmem:[%s659_s3 + $0x100] sm:$0xff]  ;;  %v232_v16 = vld [vmem:[%s661_s4 + $0x10] sm:$0x3f]  ;;  %v231_v17 = vld [vmem:[%s661_s4 + $0x8] sm:$0x1] }
  0x18   :  { %212 = vmatpush.msrb.mxu1 %v161_v35  ;;  %193 = vmatpush.msrb.mxu0 %v144_v37  ;;  %v344_v3 = vld [vmem:[%s658_s2 + $0x90] ss:$8 sm:$0x7]  ;;  %v298_v30 = vld [vmem:[%s663_s5 + $0x28] sm:$0xff] }
  0x19   :  { %176 = vmatpush.msra.mxu3 %v125_v39  ;;  %v45_v4 = vperm.slane %v344_v3, 0  ;;  %v46_v5 = vperm.slane %v344_v3, 1  ;;  %v47_v11 = vperm.slane %v344_v3, 2  ;;  %348 = vmatpush.msk.msrb.mxu2 %vm237_vm1, %v232_v16  ;;  %v230_v18 = vld [vmem:[%s661_s4] sm:$0xff]  ;;  %v300_v28 = vld [vmem:[%s663_s5 + $0x38] sm:$0xff]  ;;  %v299_v29 = vld [vmem:[%s663_s5 + $0x30] sm:$0xff] }
  0x1a   :  { %213 = vmatpush.msrb.mxu1 %v160_v38  ;;  %194 = vmatpush.msrb.mxu0 %v143_v40  ;;  %v353_v19 = vld [vmem:[%s659_s3 + $0x180] ss:$0 sm:$0xff]  ;;  %v296_v32 = vld [vmem:[%s663_s5 + $0x18] sm:$0xff]  ;;  %v295_v33 = vld [vmem:[%s663_s5 + $0x10] sm:$0xff] }
  0x1b   :  { %177 = vmatpush.msra.mxu3 %v124_v42  ;;  %350 = vmatpush.msk.msra.mxu2 %vm265_vm2, %v231_v17  ;;  %v229_v27 = vld [vmem:[%s662_s0] sm:$0xff]  ;;  %v294_v34 = vld [vmem:[%s663_s5 + $0x8] sm:$0xff]  ;;  %v354_v37 = vld [vmem:[%s661_s4 + $0x18] ss:$0 sm:$0xff] }
  0x1c   :  { %214 = vmatpush.msrb.mxu1 %v159_v41  ;;  %195 = vmatpush.msrb.mxu0 %v142_v43  ;;  %v297_v31 = vld [vmem:[%s663_s5 + $0x20] sm:$0xff] }
  0x1d   :  { %178 = vmatpush.msra.mxu3 %v123_v45  ;;  %284 = vmatpush.msra.mxu2 %v230_v18  ;;  %v293_v35 = vld [vmem:[%s663_s5] sm:$0xff]  ;;  %v356_v45 = vld [vmem:[%s663_s5 + $0x48] ss:$0 sm:$0xff] }
  0x1e   :  { %215 = vmatpush.msrb.mxu1 %v158_v44  ;;  %196 = vmatpush.msrb.mxu0 %v141_v46  ;;  %v355_v42 = vld [vmem:[%s663_s5 + $0x40] ss:$0 sm:$0xff] }
  0x1f   :  { %179 = vmatpush.msra.mxu3 %v122_v47 }
  0x20   :  { %197 = vmatpush.msrb.mxu0 %v140_v50  ;;  %216 = vmatpush.msrb.mxu1 %v157_v51 }
  0x21   :  { %180 = vmatpush.msra.mxu3 %v121_v48 }
  0x22   :  { %198 = vmatpush.msrb.mxu0 %v139_v53  ;;  %217 = vmatpush.msrb.mxu1 %v156_v54 }
  0x23   :  { %181 = vmatpush.msra.mxu3 %v120_v49  ;;  %v357_v49 = vld [vmem:[%s663_s5 + $0x50] ss:$0 sm:$0xff] }
  0x24   :  { %199 = vmatpush.msrb.mxu0 %v138_v56  ;;  %218 = vmatpush.msrb.mxu1 %v155_v57 }
  0x25   :  { %182 = vmatpush.msra.mxu3 %v119_v52 }
  0x26   :  { %200 = vmatpush.msrb.mxu0 %v137_v58  ;;  %219 = vmatpush.msrb.mxu1 %v154_v59 }
  0x27   :  { %183 = vmatpush.msra.mxu3 %v118_v55 }
  0x28   :  { %201 = vmatpush.msrb.mxu0 %v136_v60  ;;  %220 = vmatpush.msrb.mxu1 %v153_v61 }
  0x2a   :  { %202 = vmatpush.msrb.mxu0 %v135_v62  ;;  %221 = vmatpush.msrb.mxu1 %v152_v63 }
  0x2c   :  { %203 = vmatpush.msrb.mxu0 %v134_v0  ;;  %222 = vmatpush.msrb.mxu1 %v151_v1 }
  0x2e   :  { %223 = vmatpush.msrb.mxu1 %v150_v2 }
  0x8a   :  { %v72_v6 = vpop.f32.mrf.mxu0 }
  0x8b   :  { %v73_v7 = vadd.f32 %v72_v6, %v45_v4 }
  0x8c   :  { %v92_v8 = vpop.f32.mrf.mxu1 }
  0x8d   :  { %v115_v9 = vmax.f32 %v73_v7, 0.0  ;;  %v93_v10 = vadd.f32 %v92_v8, %v46_v5 }
  0x8f   :  { %184 = vmatmul.f32.vlgmr.msra.gmra.mxu3 %v115_v9  ;;  %v116_v12 = vmax.f32 %v93_v10, 0.0 }
  0x90   :  { %v112_v13 = vpop.f32.mrf.mxu2 }
  0x91   :  { %204 = vmatmul.f32.vlgmr.msrb.gmra.mxu0 %v116_v12  ;;  %v113_v14 = vadd.f32 %v112_v13, %v47_v11 }
  0x93   :  { %v117_v15 = vmax.f32 %v113_v14, 0.0 }
  0x95   :  { %224 = vmatmul.f32.vlgmr.msrb.gmra.mxu1 %v117_v15 }
 0x10e   :  { %v205_v21 = vpop.f32.mrf.mxu0 }
 0x112   :  { %v185_v20 = vpop.f32.mrf.mxu3  ;;  %v225_v23 = vpop.f32.mrf.mxu1 }
 0x113   :  { %v186_v22 = vadd.f32 %v353_v19, %v185_v20 }
 0x115   :  { %v206_v24 = vadd.f32 %v205_v21, %v186_v22 }
 0x117   :  { %v226_v25 = vadd.f32 %v225_v23, %v206_v24 }
 0x119   :  { %v228_v26 = vmax.f32 %v226_v25, 0.0 }
 0x11b   :  { %349 = vmatmul.msk.f32.vlgmr.msrb.gmra.mxu2 %vm233_vm3, %v228_v26 }
 0x11c   :  { %315 = vmatpush.msrb.mxu2 %v300_v28 }
 0x11e   :  { %316 = vmatpush.msrb.mxu2 %v299_v29 }
 0x120   :  { %317 = vmatpush.msrb.mxu2 %v298_v30 }
 0x122   :  { %318 = vmatpush.msrb.mxu2 %v297_v31 }
 0x123   :  { %351 = vmatmul.msk.f32.vlgmr.msra.gmra.mxu2 %vm261_vm4, %v229_v27 }
 0x124   :  { %319 = vmatpush.msrb.mxu2 %v296_v32 }
 0x126   :  { %320 = vmatpush.msrb.mxu2 %v295_v33 }
 0x128   :  { %321 = vmatpush.msrb.mxu2 %v294_v34 }
 0x12a   :  { %322 = vmatpush.msrb.mxu2 %v293_v35 }
 0x19e   :  { %v258_v36 = vpop.f32.mrf.mxu2 }
 0x1a6   :  { %v286_v38 = vpop.f32.mrf.mxu2 }
 0x1a7   :  { %v287_v39 = vadd.f32 %v286_v38, %v258_v36 }
 0x1a9   :  { %v291_v40 = vadd.f32 %v354_v37, %v287_v39 }
 0x1ab   :  { %358 = vtanh.f32 %v291_v40 }
 0x1b1   :  { %v359_v41 = vpop.eup %358 }
 0x1b2   :  { %352 = vmatmul.msk.f32.vlgmr.msrb.gmra.mxu2 %vm303_vm5, %v359_v41 }
 0x235   :  { %v324_v43 = vpop.f32.mrf.mxu2 }
 0x236   :  { %v325_v44 = vadd.f32 %v355_v42, %v324_v43 }
 0x238   :  { %360 = vtanh.f32 %v325_v44 }
 0x23e   :  { %v361_v46 = vpop.eup %360 }
 0x23f   :  { %v331_v47 = vmul.f32 %v361_v46, %v356_v45 }
 0x241   :  { %v333_v48 = vsel %vm332_vm6, %v331_v47, 0.0 }
 0x242   :  { %334 = vadd.xlane.f32.xlu0 %v333_v48 }
 0x2b5   :  { %v335_v50 = vpop.xlane.xlu0 %334 }
 0x2b6   :  { %v337_v51 = vadd.f32 %v357_v49, %v335_v50 }
 0x2b8   :  { %339 = vst.msk [vmem:[%s664_s6] sm:$0xff] %vm338_vm7, %v337_v51 }

</bundles_post_ra>
